<compile_context>
chip_gen: v5e
topology: v5e:2x2
jax: 0.10.0
libtpu: 0.0.40
codegen_flags: <defaults>
</compile_context>

<pallas_src>
import jax
import jax.numpy as jnp
from jax.experimental import pallas as pl
from jax.experimental.pallas import tpu as pltpu

EPS = 1e-5
LANE = 128


def masked_layer_norm_kernel(x_ref, m_ref, ic_ref, g_ref, b_ref, o_ref):
    # x_ref: (Bt, N, TF)  m_ref: (Bt, N, 1)  ic_ref: (Bt, 1, 1)
    # g_ref/b_ref: (1, TF)  o_ref: (Bt, N, TF)
    x = x_ref[...].astype(jnp.float32)
    m = m_ref[...].astype(jnp.float32)
    inv_count = ic_ref[...]                                    # (Bt, 1, 1) f32

    # Moments reduce over N only, so per-feature-tile computation is exact.
    e_x = jnp.sum(x, axis=1, keepdims=True) * inv_count        # (Bt, 1, TF)
    e_x2 = jnp.sum(x * x, axis=1, keepdims=True) * inv_count   # (Bt, 1, TF)
    var_x = e_x2 - e_x * e_x                                   # (Bt, 1, TF)

    g = g_ref[...][None]                                       # (1, 1, TF)
    b = b_ref[...][None]
    # PyTorch precedence quirk: x - (E_x / sqrt(Var+eps)); rsqrt -> EUP slot.
    c = e_x * jax.lax.rsqrt(var_x + EPS)                       # (Bt, 1, TF)
    shift = b - c * g                                          # (Bt, 1, TF)
    # 3 elementwise VPU ops per element: mul, add, mul.
    o_ref[...] = ((x * g + shift) * m).astype(o_ref.dtype)


def _pick_feature_tile(F):
    # Full-extent last-dim block unless F is a large multiple of 128 (then a
    # lane-dense sub-tile keeps blocks VMEM-friendly without any padding).
    if F % LANE == 0 and F > 512:
        for cand in (512, 384, 256, 128):
            if F % cand == 0:
                return cand
    return F


def _pick_batch_tile(B, nf, per_batch_block_bytes):
    budget = 4 * 1024 * 1024      # ~4 MiB x-block: amortizes per-step overhead
    size_floor = 512 * 1024       # don't shrink blocks below this just for step count
    bt_cap = max(1, min(B, budget // max(per_batch_block_bytes, 1)))
    # Aim for >= 8 total grid steps (megacore sharding + pipelining), best effort.
    steps_wanted = max(2, min(8, B * nf))
    b_steps = max(1, -(-steps_wanted // nf))                   # ceil
    bt_par = max(1, B // b_steps)
    bt_floor = max(1, min(bt_cap, size_floor // max(per_batch_block_bytes, 1)))
    bt = min(bt_cap, max(bt_par, bt_floor))
    # Always keep >= 2 total grid steps when there are >= 2 batch elements.
    if nf == 1 and B >= 2:
        bt = min(bt, max(1, B // 2))
    return bt


def masked_layer_norm(x, adj, masks, gamma, beta):
    """x: (B, N, F), adj: (B, N, N) (unused), masks: (B, N), gamma/beta: (F,)."""
    del adj  # not used by the reference forward pass
    B, N, F = x.shape
    itemsize = jnp.dtype(x.dtype).itemsize

    TF = _pick_feature_tile(F)
    nf = F // TF                                # TF == F or TF | F by construction
    per_batch_block_bytes = N * TF * itemsize
    Bt = _pick_batch_tile(B, nf, per_batch_block_bytes)
    nb = pl.cdiv(B, Bt)                         # cdiv: no exact-divisor requirement

    # VMEM budgeting with headroom (never the full physical limit):
    # 2x double-buffered x-block + 2x out-block + f32 temps.
    x_block_bytes = Bt * per_batch_block_bytes
    f32_block_bytes = Bt * N * TF * 4
    est_vmem = 4 * x_block_bytes + 3 * f32_block_bytes
    vmem_limit = max(48 * 1024 * 1024, int(est_vmem * 1.25))

    # Hoisted scalar work: one tiny reduction + reciprocal in the wrapper,
    # instead of nf redundant XLU/EUP reductions per batch tile in-kernel.
    inv_count = (1.0 / masks.astype(jnp.float32).sum(axis=1)).reshape(B, 1, 1)
    masks3 = masks.reshape(B, N, 1).astype(x.dtype)
    g2 = gamma.reshape(1, F).astype(jnp.float32)
    b2 = beta.reshape(1, F).astype(jnp.float32)

    x_spec_kwargs = {}
    if x_block_bytes < (1 << 20) and nb * nf >= 4:
        # Tiny blocks + many steps: a third buffer is cheap VMEM and hides
        # DMA issue latency behind the few-microsecond compute per step.
        x_spec_kwargs["pipeline_mode"] = pl.Buffered(3)

    return pl.pallas_call(
        masked_layer_norm_kernel,
        out_shape=jax.ShapeDtypeStruct((B, N, F), x.dtype),
        grid_spec=pltpu.PrefetchScalarGridSpec(
            num_scalar_prefetch=0,
            grid=(nb, nf),                      # batch tiles outer, feature tiles inner
            in_specs=[
                pl.BlockSpec((Bt, N, TF), lambda b, f: (b, 0, f), **x_spec_kwargs),  # x
                pl.BlockSpec((Bt, N, 1), lambda b, f: (b, 0, 0)),   # masks     (b only)
                pl.BlockSpec((Bt, 1, 1), lambda b, f: (b, 0, 0)),   # 1/count   (b only)
                pl.BlockSpec((1, TF), lambda b, f: (0, f)),         # gamma     (f only)
                pl.BlockSpec((1, TF), lambda b, f: (0, f)),         # beta      (f only)
            ],
            out_specs=pl.BlockSpec((Bt, N, TF), lambda b, f: (b, 0, f)),
        ),
        compiler_params=pltpu.CompilerParams(
            dimension_semantics=("parallel", "parallel"),
            vmem_limit_bytes=vmem_limit,
        ),
    )(x, masks3, inv_count, g2, b2)


def _reference(x, masks, gamma, beta):
    # Pure-JAX transcription of the PyTorch forward for verification.
    e_x = x.sum(1) / masks.sum(1)[:, None]
    e_x2 = (x ** 2).sum(1) / masks.sum(1)[:, None]
    var_x = e_x2 - e_x ** 2
    e_x, var_x = e_x[:, None, :], var_x[:, None, :]
    y = x - e_x / jnp.sqrt(var_x + EPS)
    y = y * gamma.reshape(1, 1, -1) + beta.reshape(1, 1, -1)
    return y * masks[:, :, None]


if __name__ == "__main__":
    B, N, F = 2, 8, 32
    key = jax.random.PRNGKey(0)
    kx, kadj, kg, kb = jax.random.split(key, 4)

    # masks: first batch has 6 valid nodes, second has 5 (rest padded)
    masks = jnp.array(
        [[1.0] * 6 + [0.0] * (N - 6),
         [1.0] * 5 + [0.0] * (N - 5)], dtype=jnp.float32)

    x = jax.random.normal(kx, (B, N, F), dtype=jnp.float32)
    x = x * masks[:, :, None]                    # input contract: padded rows zeroed
    adj = jax.random.bernoulli(kadj, 0.3, (B, N, N)).astype(jnp.float32)

    # Non-trivial affine params to exercise the folded gamma/beta path
    # (module init is ones/zeros; forward semantics are identical).
    gamma = 1.0 + 0.1 * jax.random.normal(kg, (F,), dtype=jnp.float32)
    beta = 0.1 * jax.random.normal(kb, (F,), dtype=jnp.float32)

    out = masked_layer_norm(x, adj, masks, gamma, beta)
    out = jax.block_until_ready(out)

    ref = _reference(x, masks, gamma, beta)
    assert out.shape == (B, N, F)
    assert jnp.allclose(out, ref, atol=1e-5, rtol=1e-5), "mismatch vs reference"

    print("KERNEL_OK")
</pallas_src>

<mosaic_0001>
module attributes {stable_mosaic.version = 11 : i64} {
  func.func @masked_layer_norm_kernel(%arg0: i32, %arg1: i32, %arg2: memref<1x8x32xf32, #tpu.memory_space<vmem>>, %arg3: memref<1x8x1xf32, #tpu.memory_space<vmem>>, %arg4: memref<1x1x1xf32, #tpu.memory_space<vmem>>, %arg5: memref<1x32xf32, #tpu.memory_space<vmem>>, %arg6: memref<1x32xf32, #tpu.memory_space<vmem>>, %arg7: memref<1x8x32xf32, #tpu.memory_space<vmem>>) attributes {dimension_semantics = [#tpu.dimension_semantics<parallel>, #tpu.dimension_semantics<parallel>], iteration_bounds = array<i64: 2, 1>, scalar_prefetch = 0 : i64, scratch_operands = 0 : i64, tpu.core_type = #tpu.core_type<tc>, window_params = [{transform_indices = @transform_0, window_bounds = array<i64: 1, 8, 32>}, {transform_indices = @transform_1, window_bounds = array<i64: 1, 8, 1>}, {transform_indices = @transform_2, window_bounds = array<i64: 1, 1, 1>}, {transform_indices = @transform_3, window_bounds = array<i64: 1, 32>}, {transform_indices = @transform_4, window_bounds = array<i64: 1, 32>}, {transform_indices = @transform_5, window_bounds = array<i64: 1, 8, 32>}]} {
    %c0 = arith.constant 0 : index
    %c0_0 = arith.constant 0 : index
    %c0_1 = arith.constant 0 : index
    %0 = vector.load %arg2[%c0, %c0_0, %c0_1] : memref<1x8x32xf32, #tpu.memory_space<vmem>>, vector<1x8x32xf32>
    %c0_2 = arith.constant 0 : index
    %c0_3 = arith.constant 0 : index
    %c0_4 = arith.constant 0 : index
    %1 = vector.load %arg3[%c0_2, %c0_3, %c0_4] : memref<1x8x1xf32, #tpu.memory_space<vmem>>, vector<1x8x1xf32>
    %c0_5 = arith.constant 0 : index
    %c0_6 = arith.constant 0 : index
    %c0_7 = arith.constant 0 : index
    %2 = vector.load %arg4[%c0_5, %c0_6, %c0_7] : memref<1x1x1xf32, #tpu.memory_space<vmem>>, vector<1x1x1xf32>
    %cst = arith.constant dense<0.000000e+00> : vector<1x32xf32>
    %3 = vector.multi_reduction <add>, %0, %cst [1] : vector<1x8x32xf32> to vector<1x32xf32>
    %4 = vector.shape_cast %3 : vector<1x32xf32> to vector<1x1x32xf32>
    %5 = vector.broadcast %2 : vector<1x1x1xf32> to vector<1x1x32xf32>
    %6 = arith.mulf %4, %5 : vector<1x1x32xf32>
    %7 = arith.mulf %0, %0 : vector<1x8x32xf32>
    %cst_8 = arith.constant dense<0.000000e+00> : vector<1x32xf32>
    %8 = vector.multi_reduction <add>, %7, %cst_8 [1] : vector<1x8x32xf32> to vector<1x32xf32>
    %9 = vector.shape_cast %8 : vector<1x32xf32> to vector<1x1x32xf32>
    %10 = vector.broadcast %2 : vector<1x1x1xf32> to vector<1x1x32xf32>
    %11 = arith.mulf %9, %10 : vector<1x1x32xf32>
    %12 = arith.mulf %6, %6 : vector<1x1x32xf32>
    %13 = arith.subf %11, %12 : vector<1x1x32xf32>
    %c0_9 = arith.constant 0 : index
    %c0_10 = arith.constant 0 : index
    %14 = vector.load %arg5[%c0_9, %c0_10] : memref<1x32xf32, #tpu.memory_space<vmem>>, vector<1x32xf32>
    %15 = vector.shape_cast %14 : vector<1x32xf32> to vector<1x1x32xf32>
    %c0_11 = arith.constant 0 : index
    %c0_12 = arith.constant 0 : index
    %16 = vector.load %arg6[%c0_11, %c0_12] : memref<1x32xf32, #tpu.memory_space<vmem>>, vector<1x32xf32>
    %17 = vector.shape_cast %16 : vector<1x32xf32> to vector<1x1x32xf32>
    %cst_13 = arith.constant 9.99999974E-6 : f32
    %18 = vector.broadcast %cst_13 : f32 to vector<1x1x32xf32>
    %19 = arith.addf %13, %18 : vector<1x1x32xf32>
    %20 = math.rsqrt %19 : vector<1x1x32xf32>
    %21 = arith.mulf %6, %20 : vector<1x1x32xf32>
    %22 = arith.mulf %21, %15 : vector<1x1x32xf32>
    %23 = arith.subf %17, %22 : vector<1x1x32xf32>
    %24 = vector.broadcast %15 : vector<1x1x32xf32> to vector<1x8x32xf32>
    %25 = arith.mulf %0, %24 : vector<1x8x32xf32>
    %26 = vector.broadcast %23 : vector<1x1x32xf32> to vector<1x8x32xf32>
    %27 = arith.addf %25, %26 : vector<1x8x32xf32>
    %28 = vector.broadcast %1 : vector<1x8x1xf32> to vector<1x8x32xf32>
    %29 = arith.mulf %27, %28 : vector<1x8x32xf32>
    %c0_14 = arith.constant 0 : index
    %c0_15 = arith.constant 0 : index
    %c0_16 = arith.constant 0 : index
    %30 = vector.load %arg7[%c0_14, %c0_15, %c0_16] : memref<1x8x32xf32, #tpu.memory_space<vmem>>, vector<1x8x32xf32>
    tpu.vector_store %arg7[%c0_14, %c0_15, %c0_16], %29 {strides = array<i32>} : memref<1x8x32xf32, #tpu.memory_space<vmem>>, vector<1x8x32xf32>,
    return
  }
  func.func @transform_0(%arg0: i32, %arg1: i32) -> (i32, i32, i32) {
    %c0_i32 = arith.constant 0 : i32
    %c0_i32_0 = arith.constant 0 : i32
    return %arg0, %c0_i32, %arg1 : i32, i32, i32
  }
  func.func @transform_1(%arg0: i32, %arg1: i32) -> (i32, i32, i32) {
    %c0_i32 = arith.constant 0 : i32
    %c0_i32_0 = arith.constant 0 : i32
    %c0_i32_1 = arith.constant 0 : i32
    return %arg0, %c0_i32, %c0_i32_0 : i32, i32, i32
  }
  func.func @transform_2(%arg0: i32, %arg1: i32) -> (i32, i32, i32) {
    %c0_i32 = arith.constant 0 : i32
    %c0_i32_0 = arith.constant 0 : i32
    %c0_i32_1 = arith.constant 0 : i32
    return %arg0, %c0_i32, %c0_i32_0 : i32, i32, i32
  }
  func.func @transform_3(%arg0: i32, %arg1: i32) -> (i32, i32) {
    %c0_i32 = arith.constant 0 : i32
    %c0_i32_0 = arith.constant 0 : i32
    return %c0_i32, %arg1 : i32, i32
  }
  func.func @transform_4(%arg0: i32, %arg1: i32) -> (i32, i32) {
    %c0_i32 = arith.constant 0 : i32
    %c0_i32_0 = arith.constant 0 : i32
    return %c0_i32, %arg1 : i32, i32
  }
  func.func @transform_5(%arg0: i32, %arg1: i32) -> (i32, i32, i32) {
    %c0_i32 = arith.constant 0 : i32
    %c0_i32_0 = arith.constant 0 : i32
    return %arg0, %c0_i32, %arg1 : i32, i32, i32
  }
}

</mosaic_0001>

<bundles_post_ra>
// kernel: tpu_custom_call.1
= control target key start
LH: loop header
LB: loop body
LE: loop exit
PB: predicated region body
PF: predicated region fallthrough
CT: control target
= control target key end

     0   :  { %10 = vsyncpa [#allocation3], 0  ;;  %s797_s0 = inlined_call_operand.vmem [shape: f32[2,8,32], index: 0, kind: input, shape index: {}]   ;;  %s798_s1 = inlined_call_operand.vmem [shape: f32[2,8,1], index: 1, kind: input, shape index: {}]   ;;  %s799_s2 = inlined_call_operand.vmem [shape: f32[2,1,1], index: 2, kind: input, shape index: {}]   ;;  %s800_s3 = inlined_call_operand.vmem [shape: f32[1,32], index: 3, kind: input, shape index: {}]   ;;  %s801_s4 = inlined_call_operand.vmem [shape: f32[1,32], index: 4, kind: input, shape index: {}]   ;;  %s802_s5 = inlined_call_operand.hbm [shape: f32[2,8,32], index: 5, kind: output, shape index: {}]  }
   0x1   :  { %12 = vsyncpa [#allocation3 + $0x1], 0  ;;  %s682_s18 = smov 0   ;;  %s684_s19 = smov 0  }
   0x2   :  { %s686_s20 = smov 0   ;;  %s688_s21 = smov 0  }
   0x3   :  { %s690_s22 = smov 0   ;;  %s692_s23 = smov 0  }
   0x4 LB: > { %s497_s24 = sadd.s32 4294967295, %s649_s23   ;;  %s498_s25 = sadd.s32 4294967294, %s649_s23   ;;  %s649_s23 = sphi %s692_s23, %s18_s23   ;;  %s645_s22 = sphi %s690_s22, %s809_s22   ;;  %s641_s21 = sphi %s688_s21, %s808_s21   ;;  %s637_s20 = sphi %s686_s20, %s807_s20   ;;  %s633_s19 = sphi %s684_s19, %s806_s19   ;;  %s629_s18 = sphi %s682_s18, %s805_s18  }
   0x5   : > { %s30_s26 = sadd.s32 1, %s645_s22  ;;  %s171_s27 = sadd.s32 1, %s637_s20 }
   0x6   : > { %p32_p0 = scmp.ge.s32.totalorder %s30_s26, 2  ;;  %p181_p1 = scmp.ne.s32.totalorder %s637_s20, %s633_s19 }
   0x7   : > { %p182_p2 = scmp.eq.s32.totalorder %s497_s24, 1  ;;  %p187_p3 = scmp.ne.s32.totalorder %s633_s19, %s629_s18 }
   0x8   : > { %s811_s26 = smov (%p32_p0, %s30_s26), 0  ;;  %p188_p5 = scmp.eq.s32.totalorder %s498_s25, 1 }
   0x9   : > { %p722_p4 = por %p182_p2, %p181_p1  ;;  %s166_s29 = ssub.s32 %s645_s22, %s811_s26 }
   0xa   : > { %p503_p6 = scmp.ge.s32.totalorder %s649_s23, 1  ;;  %p169_p7 = scmp.eq.s32.totalorder %s166_s29, 0 }
   0xb   : > { %p729_p8 = por %p188_p5, %p187_p3  ;;  %p241_p9 = scmp.lt.s32.totalorder %s649_s23, 3 }
   0xc   : > { %s735_s6 = scalar_select %p169_p7, %s637_s20, %s171_s27  }
   0xd   : > { %p242_p10 = pnand %p503_p6, %p241_p9 }
   0xe   : > { %p284_p11 = scmp.lt.s32.totalorder (!%p242_p10), %s641_s21, 1  ;;  %s281_s24 = sand.u32 (!%p242_p10), 1, %s633_s19  }
   0xf   : > { %245 = sbr.rel (%p242_p10) target bundleno = 182 (0xb6), region = 40  ;;  %s591_s8 = scalar_lea.hbm (!%p242_p10), %s802_s5, 16 }
  0x14   : > { %v651_v0 = vmov 0   ;;  %s285_s7 = scalar_select %p284_p11, %s641_s21, 1  ;;  %vm307_vm0 = vcmask 261120   ;;  %v333_v32 = vld [vmem:[%s800_s3] sm:$0x1] }
  0x15   : > { %567 = vset.pattern.permute.xlu0 %v651_v0  ;;  %v568_v35 = vld [vmem:[%s800_s3] ss:$0 sm:$0xff] }
  0x16   : > { %s297_s10 = scalar_lea.vmem %s799_s2, %s285_s7  ;;  %s505_s11 = sshll.u32 %s285_s7, 3  ;;  %v334_v36 = vld [vmem:[%s801_s4] sm:$0x1] }
  0x17   : > { %v306_v1 = vld [vmem:[%s297_s10] sm:$0x1]  ;;  %s294_s14 = scalar_lea.vmem %s798_s1, %s505_s11  ;;  %s290_s17 = scalar_lea.vmem %s797_s0, %s505_s11 }
  0x18   : > { %317 = vperm.xlu0 %567, %v306_v1   ;;  %v305_v2 = vld [vmem:[%s294_s14] sm:$0xff]  ;;  %s504_s10 = sshll.u32 %s281_s24, 3  ;;  %s508_s11 = sshll.u32 %s641_s21, 3 }
  0x19   : > { %v304_v3 = vld [vmem:[%s290_s17] sm:$0xff]  ;;  %s376_s14 = scalar_lea.hbm %s802_s5, %s508_s11  ;;  %s283_s15 = scalar_lea.vmem [#allocation2], %s504_s10 }
  0x1a   : > { %v322_v4 = vmul.f32 %v304_v3, %v304_v3  ;;  %v308_v5 = vsel %vm307_vm0, %v304_v3, 0.0  ;;  %v352_v39 = vmul.f32 %v568_v35, %v304_v3  ;;  %s378_s16 = sshll.u32 %s283_s15, 4  ;;  %s380_s17 = sshll.u32 %s376_s14, 4  ;;  %s379_s16 = int_to_ptr.vmem [resolvable:$true] %s378_s16  ;;  %s381_s17 = int_to_ptr.hbm [resolvable:$true] %s380_s17 }
  0x1b   : > { %v309_v7 = vrot.slane %v308_v5, 4  ;;  %s365_s21 = scalar_lea.sflag [#allocation3], %s281_s24  ;;  %s585_s25 = sshra.s32 %s381_s17, 4  ;;  %s586_s25 = int_to_ptr.hbm [resolvable:$true] %s585_s25 }
  0x1c   : > { %v323_v6 = vsel %vm307_vm0, %v322_v4, 0.0  ;;  %s587_s27 = scalar_lea.hbm %s586_s25, 8  ;;  %p592_p1 = scmp.lt.s32.totalorder %s586_s25, %s802_s5 }
  0x1d   : > { %v324_v8 = vrot.slane %v323_v6, 4  ;;  %v310_v9 = vadd.f32 %v309_v7, %v308_v5  ;;  %p588_p12 = scmp.ne.s32.totalorder %s586_s25, %s587_s27  ;;  %p593_p2 = scmp.lt.s32.totalorder %s591_s8, %s587_s27 }
  0x1f   : > { %v325_v10 = vadd.f32 %v324_v8, %v323_v6  ;;  %v311_v11 = vrot.slane %v310_v9, 2  ;;  %p589_p13 = pnand %p588_p12, %p722_p4  ;;  %p594_p3 = por %p593_p2, %p592_p1 }
  0x20   : > { %359 = vperm.xlu0 %567, %v305_v2  }
  0x21   : > { %v326_v12 = vrot.slane %v325_v10, 2  ;;  %v312_v13 = vadd.f32 %v311_v11, %v310_v9  ;;  %p590_p0 = pneg %p589_p13 }
  0x23   : > { %v327_v14 = vadd.f32 %v326_v12, %v325_v10  ;;  %v313_v15 = vrot.slane %v312_v13, 1  ;;  %p595_p5 = pnand %p594_p3, %p590_p0 }
  0x25   : > { %v328_v16 = vrot.slane %v327_v14, 1  ;;  %v314_v17 = vadd.f32 %v313_v15, %v312_v13 }
  0x27   : > { %v329_v20 = vadd.f32 %v328_v16, %v327_v14 }
  0x8a   : > { %v318_v18 = vpop.permute.xlu0 %317 }
  0x8b   : > { %v320_v19 = vperm.slane %v318_v18, 0 }
  0x8d   : > { %v321_v21 = vmul.f32 %v320_v19, %v314_v17  ;;  %v330_v22 = vmul.f32 %v329_v20, %v320_v19 }
  0x8f   : > { %v331_v23 = vmul.f32 %v321_v21, %v321_v21 }
  0x91   : > { %v332_v24 = vsub.f32 %v330_v22, %v331_v23 }
  0x92   : > { %v360_v42 = vpop.permute.xlu0 %359 }
  0x93   : > { %v335_v25 = vadd.f32 1e-05, %v332_v24 }
  0x95   : > { %569 = vrsqrt.f32 %v335_v25  ;;  %vm342_vm2 = vweird.f32 %v335_v25 }
  0x9b   : > { %v570_v26 = vpop.eup %569 }
  0x9c   : > { %v337_v27 = vmul.f32 %v570_v26, %v335_v25  ;;  %vm343_vm1 = vweird.f32 %v570_v26 }
  0x9d   : > { %vm344_vm3 = vmor %vm342_vm2, %vm343_vm1 }
  0x9e   : > { %v338_v28 = vmul.f32 %v570_v26, %v337_v27 }
  0xa0   : > { %v339_v29 = vmul.f32 0.5, %v338_v28 }
  0xa2   : > { %v340_v30 = vsub.f32 1.5, %v339_v29 }
  0xa4   : > { %v341_v31 = vmul.f32 %v570_v26, %v340_v30 }
  0xa6   : > { %v345_v33 = vsel %vm344_vm3, %v570_v26, %v341_v31 }
  0xa7   : > { %v346_v34 = vmul.f32 %v345_v33, %v321_v21 }
  0xa9   : > { %v347_v37 = vmul.f32 %v346_v34, %v333_v32 }
  0xab   : > { %v348_v38 = vsub.f32 %v334_v36, %v347_v37 }
  0xad   : > { %v354_v40 = vperm.slane %v348_v38, 0 }
  0xaf   : > { %v356_v41 = vadd.f32 %v354_v40, %v352_v39 }
  0xb1   : > { %v362_v43 = vmul.f32 %v360_v42, %v356_v41 }
  0xb3   : > { %363 = vst.msk [vmem:[%s283_s15] sm:$0xff] %vm307_vm0, %v362_v43 }
  0xb4   : > { %598 = shalt.err (!%p595_p5)
}
  0xb5   : > { %511 = dma.vmem_to_hbm [thread:$0]  (%p722_p4), %s379_s16, 128, %s381_s17, %s365_s21  }
  0xb6 PF: > { %p517_p6 = scmp.ge.s32.totalorder %s649_s23, 2  ;;  %s392_s24 = sand.u32 1, %s629_s18  }
  0xb7   : > { %s393_s11 = scalar_lea.sflag [#allocation3], %s392_s24 }
  0xb8   : > { %p514_p7 = pnand %p517_p6, %p729_p8 }
  0xba   : > { %p515_p9 = pneg %p514_p7 }
  0xbc   : > { %624 = dma.done.wait (%p515_p9), %s393_s11, 128  }
  0xbd   : > { %626 = vsyncadd (%p515_p9), %s393_s11, 4294967168  ;;  %s18_s23 = sadd.s32 1, %s649_s23   ;;  %s805_s18 = smov %s633_s19 }
  0xbe   : > { %p15_p10 = scmp.ge.s32.totalorder %s18_s23, 4   ;;  %s806_s19 = smov %s637_s20 }
  0xbf   : > { %s807_s20 = smov %s735_s6  ;;  %s808_s21 = smov %s645_s22 }
  0xc0   : > { %s809_s22 = smov %s811_s26  ;;  %17 = sbr.rel (!%p15_p10) target bundleno = 4 (0x4), region = 87 }
  0xc5   :  { %399 = vsyncpa [#allocation3], 1 }
  0xc6   :  { %401 = vsyncpa [#allocation3 + $0x1], 1 }

</bundles_post_ra>
